<compile_context>
chip_gen: v7x
topology: tpu7x:2x2x1
jax: 0.10.0
libtpu: 0.0.40
codegen_flags: <defaults>
</compile_context>

<pallas_src>
import jax
import jax.numpy as jnp
from jax.experimental import pallas as pl
from jax.experimental.pallas import tpu as pltpu


def _self_attention_image_kernel(vproc_ref, inpv_ref, wi_ref, wo_ref, o_ref):
    # vproc_ref: (TB, N, Di) bf16   current batch tile, processed features
    # inpv_ref : (TB, N, Dv) bf16   current batch tile, raw features
    # wi_ref   : (Di, H)     bf16   inner_matrix.weight^T (resident in VMEM)
    # wo_ref   : (1, H)      f32    outer_matrix.weight, output_dim == 1
    # o_ref    : (TB, Dv)    f32
    TB, N, Di = vproc_ref.shape
    H = wi_ref.shape[1]

    # Inner linear: one large MXU matmul over all TB*N rows, f32 accumulation.
    vp = vproc_ref[...].reshape(TB * N, Di)
    h = jnp.dot(vp, wi_ref[...], preferred_element_type=jnp.float32)   # (TB*N, H)
    h = jnp.maximum(h, 0.0)                                            # ReLU (VPU)

    # Outer linear with a single output unit: broadcast-multiply + lane reduce,
    # producing lane-dense (TB, N) scores (no 1-column matmul, no transpose).
    h3 = h.reshape(TB, N, H)
    s = jnp.sum(h3 * wo_ref[...], axis=-1)                             # (TB, N)

    # Numerically-stable softmax over the region axis (torch dim=1).
    m = jnp.max(s, axis=-1, keepdims=True)                             # (TB, 1)
    e = jnp.exp(s - m)                                                 # EUP
    denom = jnp.sum(e, axis=-1, keepdims=True)                         # (TB, 1)
    attn = e * pl.reciprocal(denom, approx=True)                       # (TB, N)

    # Attention-weighted pooling of input_v over the N regions (f32 math),
    # lane-dense on Dv.
    inpv = inpv_ref[...].astype(jnp.float32)                           # (TB, N, Dv)
    out = jnp.sum(attn[:, :, None] * inpv, axis=1)                     # (TB, Dv)
    o_ref[...] = out.astype(o_ref.dtype)


def _choose_tb(B, N, Di, Dv):
    """Batch-tile size: fill the MXU (TB*N >= ~256 rows) within a VMEM budget
    conservative enough for v7x (64 MiB physical / 32 MiB scoped default)."""
    budget = 20 << 20                                  # bytes for activation tiles
    per_b = 2 * 2 * N * (Di + Dv) * 2                  # 2 inputs x 2 buffers x bf16
    tb_cap = max(1, budget // max(per_b, 1))
    tb = min(B, max(8, pl.cdiv(256, N)), tb_cap)
    if tb < B:
        tb = max(8, (tb // 8) * 8)                     # keep output block 8-aligned
    return tb


def self_attention_image(v_proc, input_v, w_inner, w_outer):
    """Pallas forward of SelfAttentionImage.

    v_proc : (B, N, Di)  input to inner_matrix
    input_v: (B, N, Dv)  features pooled by the attention weights
    w_inner: (H, Di)     nn.Linear(input_dim, hidden_dim, bias=False).weight
    w_outer: (Do, H)     nn.Linear(hidden_dim, output_dim, bias=False).weight
    returns: (B, Dv) float32
    """
    B, N, Di = v_proc.shape
    _, _, Dv = input_v.shape
    H = w_inner.shape[0]
    Do = w_outer.shape[0]
    assert Do == 1, "reference squeeze/unsqueeze/matmul chain requires output_dim == 1"
    # TODO(synk): generalize to output_dim > 1 (the torch forward's broadcasted
    # matmul is only well-defined for output_dim == 1).

    # One-time layout/dtype plumbing outside the kernel: bf16 activations + Wi
    # halve HBM traffic on this bandwidth-bound op; Wi is pre-transposed so the
    # kernel emits no XLU transpose. Post-matmul math stays f32 in-kernel.
    vp = v_proc.astype(jnp.bfloat16)
    iv = input_v.astype(jnp.bfloat16)
    wi_t = w_inner.astype(jnp.bfloat16).T              # (Di, H)
    wo_r = w_outer.astype(jnp.float32)                 # (1, H)

    TB = _choose_tb(B, N, Di, Dv)
    B_pad = pl.cdiv(B, TB) * TB
    if B_pad != B:
        pad = ((0, B_pad - B), (0, 0), (0, 0))
        vp = jnp.pad(vp, pad)                          # zero rows -> finite garbage-free
        iv = jnp.pad(iv, pad)                          # outputs that get sliced away

    flops = 2 * B * N * Di * H + 2 * B * N * H + 2 * B * N * Dv
    bytes_accessed = 2 * B * N * (Di + Dv) + 2 * Di * H + 4 * H + 4 * B * Dv

    out = pl.pallas_call(
        _self_attention_image_kernel,
        out_shape=jax.ShapeDtypeStruct((B_pad, Dv), jnp.float32),
        grid_spec=pltpu.PrefetchScalarGridSpec(
            num_scalar_prefetch=0,
            grid=(B_pad // TB,),
            in_specs=[
                pl.BlockSpec((TB, N, Di), lambda b: (b, 0, 0)),
                pl.BlockSpec((TB, N, Dv), lambda b: (b, 0, 0)),
                # Constant index_map -> weight blocks stay resident in VMEM
                # across the whole grid (DMA'd once).
                # TODO(synk): pipeline_mode=pl.Buffered(1) to force
                # single-buffering of the invariant weights once confirmed
                # supported on the target jax version.
                pl.BlockSpec((Di, H), lambda b: (0, 0)),
                pl.BlockSpec((1, H), lambda b: (0, 0)),
            ],
            out_specs=pl.BlockSpec((TB, Dv), lambda b: (b, 0)),
        ),
        compiler_params=pltpu.CompilerParams(
            dimension_semantics=("parallel",),
            vmem_limit_bytes=32 << 20),
        cost_estimate=pl.CostEstimate(
            flops=flops, transcendentals=B * N, bytes_accessed=bytes_accessed),
    )(vp, iv, wi_t, wo_r)
    return out[:B]                                     # (B, Dv)


def _reference(v_proc, input_v, w_inner, w_outer):
    h = jnp.maximum(
        jnp.einsum("bnd,hd->bnh", v_proc, w_inner, precision="highest"), 0.0)
    s = jnp.einsum("bnh,oh->bno", h, w_outer, precision="highest")  # (B, N, 1)
    attn = jax.nn.softmax(s, axis=1)[..., 0]                        # (B, N)
    return jnp.einsum("bn,bnd->bd", attn, input_v, precision="highest")


if __name__ == "__main__":
    B, N = 2, 8
    Di, H, Dv, Do = 32, 32, 48, 1

    key = jax.random.PRNGKey(0)
    k1, k2, k3, k4 = jax.random.split(key, 4)

    v_proc = jax.random.normal(k1, (B, N, Di), dtype=jnp.float32)
    input_v = jax.random.normal(k2, (B, N, Dv), dtype=jnp.float32)

    # nn.Linear-style init: U(-1/sqrt(fan_in), 1/sqrt(fan_in)), weight (out, in), no bias.
    w_inner = jax.random.uniform(k3, (H, Di), jnp.float32,
                                 minval=-1.0 / Di ** 0.5, maxval=1.0 / Di ** 0.5)
    w_outer = jax.random.uniform(k4, (Do, H), jnp.float32,
                                 minval=-1.0 / H ** 0.5, maxval=1.0 / H ** 0.5)

    out = self_attention_image(v_proc, input_v, w_inner, w_outer)
    out = jax.block_until_ready(out)

    # Reference on the same bf16-rounded activations/weights (f32 math), so the
    # only deltas are f32-accumulated MXU summation order and the EUP approx
    # reciprocal in the softmax normalization.
    ref = _reference(v_proc.astype(jnp.bfloat16).astype(jnp.float32),
                     input_v.astype(jnp.bfloat16).astype(jnp.float32),
                     w_inner.astype(jnp.bfloat16).astype(jnp.float32),
                     w_outer)

    assert out.shape == (B, Dv)
    assert bool(jnp.all(jnp.isfinite(out)))
    assert bool(jnp.allclose(out, ref, atol=3e-3, rtol=3e-3))

    print("KERNEL_OK")
</pallas_src>

<mosaic_0001>
module attributes {stable_mosaic.version = 11 : i64} {
  func.func @_self_attention_image_kernel(%arg0: i32, %arg1: memref<2x8x32xbf16, #tpu.memory_space<vmem>>, %arg2: memref<2x8x48xbf16, #tpu.memory_space<vmem>>, %arg3: memref<32x32xbf16, #tpu.memory_space<vmem>>, %arg4: memref<1x32xf32, #tpu.memory_space<vmem>>, %arg5: memref<2x48xf32, #tpu.memory_space<vmem>>) attributes {dimension_semantics = [#tpu.dimension_semantics<parallel>], iteration_bounds = array<i64: 1>, scalar_prefetch = 0 : i64, scratch_operands = 0 : i64, tpu.core_type = #tpu.core_type<tc>, window_params = [{transform_indices = @transform_0, window_bounds = array<i64: 2, 8, 32>}, {transform_indices = @transform_1, window_bounds = array<i64: 2, 8, 48>}, {pipeline_mode = #tpu.pipeline_mode<synchronous>, transform_indices = @transform_2, window_bounds = array<i64: 32, 32>}, {pipeline_mode = #tpu.pipeline_mode<synchronous>, transform_indices = @transform_3, window_bounds = array<i64: 1, 32>}, {transform_indices = @transform_4, window_bounds = array<i64: 2, 48>}]} {
    %c0 = arith.constant 0 : index
    %c0_0 = arith.constant 0 : index
    %c0_1 = arith.constant 0 : index
    %0 = vector.load %arg1[%c0, %c0_0, %c0_1] : memref<2x8x32xbf16, #tpu.memory_space<vmem>>, vector<2x8x32xbf16>
    %1 = vector.shape_cast %0 : vector<2x8x32xbf16> to vector<16x32xbf16>
    %c0_2 = arith.constant 0 : index
    %c0_3 = arith.constant 0 : index
    %2 = vector.load %arg3[%c0_2, %c0_3] : memref<32x32xbf16, #tpu.memory_space<vmem>>, vector<32x32xbf16>
    %cst = arith.constant dense<0.000000e+00> : vector<16x32xf32>
    %3 = tpu.matmul %1, %2, %cst {dimension_numbers = #tpu.dot_dimension_numbers<[1], [0], [0], [1], [0, 0, 1, 1], [], []>} : vector<16x32xbf16>, vector<32x32xbf16>, vector<16x32xf32> -> vector<16x32xf32>
    %cst_4 = arith.constant 0.000000e+00 : f32
    %4 = vector.broadcast %cst_4 : f32 to vector<16x32xf32>
    %5 = arith.maximumf %3, %4 : vector<16x32xf32>
    %6 = vector.shape_cast %5 : vector<16x32xf32> to vector<2x8x32xf32>
    %c0_5 = arith.constant 0 : index
    %c0_6 = arith.constant 0 : index
    %7 = vector.load %arg4[%c0_5, %c0_6] : memref<1x32xf32, #tpu.memory_space<vmem>>, vector<1x32xf32>
    %8 = vector.shape_cast %7 : vector<1x32xf32> to vector<1x1x32xf32>
    %9 = vector.broadcast %8 : vector<1x1x32xf32> to vector<2x8x32xf32>
    %10 = arith.mulf %6, %9 : vector<2x8x32xf32>
    %cst_7 = arith.constant dense<0.000000e+00> : vector<2x8xf32>
    %11 = vector.multi_reduction <add>, %10, %cst_7 [2] : vector<2x8x32xf32> to vector<2x8xf32>
    %cst_8 = arith.constant dense<0xFF800000> : vector<2xf32>
    %12 = vector.multi_reduction <maximumf>, %11, %cst_8 [1] : vector<2x8xf32> to vector<2xf32>
    %13 = vector.shape_cast %12 : vector<2xf32> to vector<2x1xf32>
    %14 = vector.broadcast %13 : vector<2x1xf32> to vector<2x8xf32>
    %15 = arith.subf %11, %14 : vector<2x8xf32>
    %16 = math.exp %15 : vector<2x8xf32>
    %cst_9 = arith.constant dense<0.000000e+00> : vector<2xf32>
    %17 = vector.multi_reduction <add>, %16, %cst_9 [1] : vector<2x8xf32> to vector<2xf32>
    %18 = vector.shape_cast %17 : vector<2xf32> to vector<2x1xf32>
    %19 = tpu.reciprocal %18 {approx = true} : vector<2x1xf32> -> vector<2x1xf32>
    %20 = vector.broadcast %19 : vector<2x1xf32> to vector<2x8xf32>
    %21 = arith.mulf %16, %20 : vector<2x8xf32>
    %c0_10 = arith.constant 0 : index
    %c0_11 = arith.constant 0 : index
    %c0_12 = arith.constant 0 : index
    %22 = vector.load %arg2[%c0_10, %c0_11, %c0_12] : memref<2x8x48xbf16, #tpu.memory_space<vmem>>, vector<2x8x48xbf16>
    %23 = arith.extf %22 : vector<2x8x48xbf16> to vector<2x8x48xf32>
    %24 = vector.shape_cast %21 : vector<2x8xf32> to vector<2x8x1xf32>
    %25 = vector.broadcast %24 : vector<2x8x1xf32> to vector<2x8x48xf32>
    %26 = arith.mulf %25, %23 : vector<2x8x48xf32>
    %cst_13 = arith.constant dense<0.000000e+00> : vector<2x48xf32>
    %27 = vector.multi_reduction <add>, %26, %cst_13 [1] : vector<2x8x48xf32> to vector<2x48xf32>
    %c0_14 = arith.constant 0 : index
    %c0_15 = arith.constant 0 : index
    %28 = vector.load %arg5[%c0_14, %c0_15] : memref<2x48xf32, #tpu.memory_space<vmem>>, vector<2x48xf32>
    tpu.vector_store %arg5[%c0_14, %c0_15], %27 {strides = array<i32>} : memref<2x48xf32, #tpu.memory_space<vmem>>, vector<2x48xf32>,
    return
  }
  func.func @transform_0(%arg0: i32) -> (i32, i32, i32) {
    %c0_i32 = arith.constant 0 : i32
    %c0_i32_0 = arith.constant 0 : i32
    %c0_i32_1 = arith.constant 0 : i32
    return %arg0, %c0_i32, %c0_i32_0 : i32, i32, i32
  }
  func.func @transform_1(%arg0: i32) -> (i32, i32, i32) {
    %c0_i32 = arith.constant 0 : i32
    %c0_i32_0 = arith.constant 0 : i32
    %c0_i32_1 = arith.constant 0 : i32
    return %arg0, %c0_i32, %c0_i32_0 : i32, i32, i32
  }
  func.func @transform_2(%arg0: i32) -> (i32, i32) {
    %c0_i32 = arith.constant 0 : i32
    %c0_i32_0 = arith.constant 0 : i32
    %c0_i32_1 = arith.constant 0 : i32
    return %c0_i32, %c0_i32_0 : i32, i32
  }
  func.func @transform_3(%arg0: i32) -> (i32, i32) {
    %c0_i32 = arith.constant 0 : i32
    %c0_i32_0 = arith.constant 0 : i32
    %c0_i32_1 = arith.constant 0 : i32
    return %c0_i32, %c0_i32_0 : i32, i32
  }
  func.func @transform_4(%arg0: i32) -> (i32, i32) {
    %c0_i32 = arith.constant 0 : i32
    %c0_i32_0 = arith.constant 0 : i32
    return %arg0, %c0_i32 : i32, i32
  }
}

</mosaic_0001>

<bundles_post_ra>
// kernel: tpu_custom_call.1
= control target key start
LH: loop header
LB: loop body
LE: loop exit
PB: predicated region body
PF: predicated region fallthrough
CT: control target
= control target key end

     0   :  { %9 = vsyncpa [#allocation3], 0  ;;  %s509_s0 = inlined_call_operand.hbm [shape: bf16[2,8,32], index: 0, kind: input, shape index: {}]   ;;  %s510_s1 = inlined_call_operand.hbm [shape: bf16[2,8,48], index: 1, kind: input, shape index: {}]   ;;  %s511_s2 = inlined_call_operand.hbm [shape: bf16[32,32], index: 2, kind: input, shape index: {}]   ;;  %s512_s3 = inlined_call_operand.vmem [shape: f32[1,32], index: 3, kind: input, shape index: {}]   ;;  %s513_s4 = inlined_call_operand.hbm [shape: f32[2,48], index: 4, kind: output, shape index: {}]  }
   0x1   :  { %10 = vsyncpa [#allocation6], 0 }
   0x2   :  { %11 = vsyncpa [#allocation4], 0  ;;  %s403_s15 = smov [#allocation5]   ;;  %s404_s17 = smov [#allocation2]  }
   0x3   :  { %s29_s16 = sshll.u32 %s403_s15, 4  ;;  %s17_s18 = sshll.u32 %s404_s17, 4  ;;  %s30_s16 = int_to_ptr.vmem [resolvable:$true] %s29_s16  ;;  %s437_s18 = int_to_ptr.vmem [resolvable:$true] %s17_s18 }
   0x4   :  { %s309_s21 = scalar_lea.hbm %s510_s1, 128 }
   0x5   :  { %p310_p0 = scmp.ne.s32.totalorder %s510_s1, %s309_s21  ;;  %p313_p1 = scmp.lt.u32.totalorder %s309_s21, %s510_s1 }
   0x7   :  { %p315_p2 = pnand %p313_p1, %p310_p0 }
   0x9   :  { %318 = shalt.err (!%p315_p2)
}
   0xa   :  { %s319_s26 = scalar_lea.vmem %s30_s16, 128  ;;  %p324_p4 = scmp.lt.s32.totalorder %s30_s16, %s30_s16 }
   0xb   :  { %p320_p3 = scmp.ne.s32.totalorder %s30_s16, %s319_s26  ;;  %p325_p5 = scmp.lt.s32.totalorder %s319_s26, %s319_s26 }
   0xd   :  { %p326_p6 = por %p325_p5, %p324_p4 }
   0xf   :  { %p327_p7 = pnand %p326_p6, %p320_p3 }
  0x11   :  { %330 = shalt.err (!%p327_p7)
}
  0x12   :  { %s405_s27 = smov 64   ;;  %s406_s28 = smov 4  }
  0x13   :  { %35 = dma.hbm_to_vmem [thread:$0]  %s510_s1, 128, %s30_s16, [#allocation6], %s405_s27, %s405_s27, %s406_s28  }
  0x14   :  { %s331_s7 = scalar_lea.hbm %s509_s0, 128 }
  0x15   :  { %p332_p8 = scmp.ne.s32.totalorder %s509_s0, %s331_s7  ;;  %p335_p9 = scmp.lt.u32.totalorder %s331_s7, %s509_s0 }
  0x17   :  { %p337_p10 = pnand %p335_p9, %p332_p8 }
  0x19   :  { %340 = shalt.err (!%p337_p10)
}
  0x1a   :  { %s341_s12 = scalar_lea.vmem %s437_s18, 128  ;;  %p346_p12 = scmp.lt.s32.totalorder %s437_s18, %s437_s18 }
  0x1b   :  { %p342_p11 = scmp.ne.s32.totalorder %s437_s18, %s341_s12  ;;  %p347_p13 = scmp.lt.s32.totalorder %s341_s12, %s341_s12 }
  0x1d   :  { %p348_p0 = por %p347_p13, %p346_p12 }
  0x1f   :  { %p349_p1 = pnand %p348_p0, %p342_p11 }
  0x21   :  { %352 = shalt.err (!%p349_p1)
}
  0x22   :  { %23 = dma.hbm_to_vmem [thread:$0]  %s509_s0, 128, %s437_s18, [#allocation3], %s405_s27, %s405_s27, %s406_s28  }
  0x23   :  { %s407_s14 = smov [#allocation7]   ;;  %s353_s19 = scalar_lea.hbm %s511_s2, 256 }
  0x24   :  { %s41_s15 = sshll.u32 %s407_s14, 4  ;;  %p354_p2 = scmp.ne.s32.totalorder %s511_s2, %s353_s19  ;;  %s42_s15 = int_to_ptr.vmem [resolvable:$true] %s41_s15 }
  0x25   :  { %p357_p3 = scmp.lt.u32.totalorder %s353_s19, %s511_s2 }
  0x27   :  { %p359_p4 = pnand %p357_p3, %p354_p2 }
  0x29   :  { %362 = shalt.err (!%p359_p4)
}
  0x2a   :  { %s363_s24 = scalar_lea.vmem %s42_s15, 256  ;;  %p368_p6 = scmp.lt.s32.totalorder %s42_s15, %s42_s15 }
  0x2b   :  { %p364_p5 = scmp.ne.s32.totalorder %s42_s15, %s363_s24  ;;  %p369_p7 = scmp.lt.s32.totalorder %s363_s24, %s363_s24 }
  0x2d   :  { %p370_p8 = por %p369_p7, %p368_p6 }
  0x2f   :  { %p371_p9 = pnand %p370_p8, %p364_p5 }
  0x31   :  { %374 = shalt.err (!%p371_p9)
}
  0x32   :  { %47 = dma.hbm_to_vmem [thread:$0]  %s511_s2, 256, %s42_s15, [#allocation6], %s405_s27, %s405_s27, %s406_s28  }
  0x33   :  { %397 = dma.done.wait [#allocation3], 128  }
  0x34   :  { %398 = vsyncadd [#allocation3], 4294967168 }
  0x35   :  { %399 = dma.done.wait [#allocation6], 384  }
  0x36   :  { %400 = vsyncadd [#allocation6], 4294966912  ;;  %v408_v0 = vmov 0.0   ;;  %vm409_vm0 = vmmov 0   ;;  %v300_v1 = vld [vmem:[#allocation7] sm:$0xff]   ;;  %v301_v2 = vld [vmem:[#allocation7 + $0x8] sm:$0xff]   ;;  %v147_v15 = vlaneseq }
  0x37   :  { %281 = vmatprep.subr.bf16.mxu0 %v408_v0  ;;  %285 = vmatprep.mubr.msk.bf16.mxu0 %vm409_vm0, %v408_v0  ;;  %v302_v3 = vld [vmem:[#allocation2] sm:$0xff]   ;;  %vm83_vm1 = vcmask 261120   ;;  %vm157_vm2 = vcmask 1041409   ;;  %vm160_vm3 = vcmask 58368   ;;  %v410_v25 = vmov 0   ;;  %v275_v49 = vld [vmem:[#allocation5] sm:$0xff]  }
  0x38   :  { %282 = vmatpush3.bf16.msra.mxu0 %v300_v1  ;;  %v273_v5 = vld [vmem:[%s512_s3] ss:$0 sm:$0xff]  ;;  %v148_v16 = vand.u32 127, %v147_v15  ;;  %v150_v17 = vshrl.u32 %v147_v15, 7  ;;  %299 = vset.pattern.permute.xlu0 %v410_v25  ;;  %v276_v50 = vunpack.c.l.bf16 %v275_v49  ;;  %vm232_vm4 = vcmask 392192   ;;  %s411_s2 = smov [#allocation8]  }
  0x39   :  { %283 = vmatprep.subr.bf16.mxu0 %v408_v0  ;;  %298 = vset.pattern.permute.xlu1 %v410_v25  ;;  %v277_v53 = vunpack.c.h.bf16 %v275_v49  ;;  %s259_s3 = sshll.u32 %s411_s2, 4  ;;  %vm251_vm5 = vcmask 386048   ;;  %s260_s3 = int_to_ptr.vmem [resolvable:$true] %s259_s3 }
  0x3a   :  { %v151_v19 = vsub.s32 %v148_v16, %v150_v17  ;;  %v167_v26 = vsub.s32 0, %v150_v17  ;;  %v171_v27 = vsub.s32 1, %v150_v17  ;;  %s375_s27 = scalar_lea.vmem %s260_s3, 32  ;;  %p380_p11 = scmp.lt.s32.totalorder %s260_s3, %s260_s3 }
  0x3b   :  { %p376_p10 = scmp.ne.s32.totalorder %s260_s3, %s375_s27  ;;  %p381_p12 = scmp.lt.s32.totalorder %s375_s27, %s375_s27 }
  0x3c   :  { %284 = vmatpush3.bf16.msra.mxu0 %v301_v2 }
  0x3d   :  { %p382_p13 = por %p381_p12, %p380_p11 }
  0x3f   :  { %286 = vmatmul.mubr.msk.bf16.vlgmr.msra.gmra.mrb[0].mxu0 %vm83_vm1, %v302_v3  ;;  %p383_p0 = pnand %p382_p13, %p376_p10 }
 0x112   :  { %v121_v4 = vpop.f32.mrb[0].mxu0 }
 0x113   :  { %v128_v6 = vmax.f32 %v121_v4, 0.0  ;;  %v287_v7 = vpop.f32.mrb[1].mxu0 }
 0x114   :  { %v124_v8 = vpop.f32.mrb[2].mxu0 }
 0x115   :  { %v129_v9 = vmax.f32 %v124_v8, 0.0  ;;  %v288_v10 = vpop.f32.mrb[3].mxu0  ;;  %v137_v11 = vmul.f32 %v273_v5, %v128_v6 }
 0x117   :  { %v139_v12 = vsel %vm83_vm1, %v137_v11, 0.0  ;;  %v138_v13 = vmul.f32 %v273_v5, %v129_v9 }
 0x118   :  { %140 = vadd.xlane.f32.xlu0 %v139_v12 }
 0x119   :  { %v142_v14 = vsel %vm83_vm1, %v138_v13, 0.0 }
 0x11c   :  { %143 = vadd.xlane.f32.xlu0 %v142_v14 }
 0x1a5   :  { %v141_v18 = vpop.xlane.xlu0 %140 }
 0x1a6   :  { %v152_v21 = vrot.slane %v141_v18, %v151_v19 }
 0x1a9   :  { %v144_v20 = vpop.xlane.xlu0 %143 }
 0x1aa   :  { %v156_v22 = vrot.slane %v144_v20, %v151_v19 }
 0x1ac   :  { %v158_v23 = vsel %vm157_vm2, %v156_v22, %v152_v21 }
 0x1ad   :  { %v161_v24 = vsel %vm160_vm3, %v158_v23, -inf }
 0x1ae   :  { %162 = vmax.xlane.f32.xlu1 %v161_v24 }
 0x23b   :  { %v163_v28 = vpop.xlane.xlu1 %162 }
 0x23c   :  { %v168_v29 = vrot.slane %v163_v28, %v167_v26  ;;  %v172_v30 = vrot.slane %v163_v28, %v171_v27 }
 0x23e   :  { %v175_v31 = vsub.f32 %v141_v18, %v168_v29  ;;  %v176_v32 = vsub.f32 %v144_v20, %v172_v30 }
 0x240   :  { %v177_v33 = vmul.f32 1.442695, %v175_v31  ;;  %v179_v34 = vmul.f32 1.442695, %v176_v32 }
 0x242   :  { %303 = vpow2.f32 %v177_v33 }
 0x243   :  { %305 = vpow2.f32 %v179_v34 }
 0x24c   :  { %v304_v35 = vpop.eup %303 }
 0x24d   :  { %v306_v36 = vpop.eup %305  ;;  %184 = vperm.xlu1 %298, %v304_v35  }
 0x24e   :  { %187 = vperm.xlu0 %299, %v306_v36  }
 0x2cc   :  { %v185_v37 = vpop.permute.xlu1 %184 }
 0x2cd   :  { %v188_v38 = vpop.permute.xlu0 %187  ;;  %v192_v39 = vrot.slane %v185_v37, %v151_v19 }
 0x2ce   :  { %v196_v40 = vrot.slane %v188_v38, %v151_v19 }
 0x2d0   :  { %v197_v41 = vsel %vm157_vm2, %v196_v40, %v192_v39 }
 0x2d1   :  { %v199_v42 = vsel %vm160_vm3, %v197_v41, 0.0 }
 0x2d2   :  { %200 = vadd.xlane.f32.xlu1 %v199_v42 }
 0x35f   :  { %v201_v43 = vpop.xlane.xlu1 %200 }
 0x360   :  { %307 = vrcp.f32 %v201_v43 }
 0x36a   :  { %v308_v44 = vpop.eup %307 }
 0x36b   :  { %v207_v45 = vrot.slane %v308_v44, %v167_v26  ;;  %v211_v47 = vrot.slane %v308_v44, %v171_v27 }
 0x36d   :  { %v214_v46 = vmul.f32 %v304_v35, %v207_v45  ;;  %v215_v48 = vmul.f32 %v306_v36, %v211_v47 }
 0x36f   :  { %222 = vperm.xlu0 %299, %v214_v46  }
 0x373   :  { %227 = vperm.xlu0 %299, %v215_v48  }
 0x3ee   :  { %v223_v51 = vpop.permute.xlu0 %222 }
 0x3ef   :  { %v230_v52 = vmul.f32 %v276_v50, %v223_v51 }
 0x3f1   :  { %v233_v54 = vsel %vm232_vm4, %v230_v52, 0.0 }
 0x3f2   :  { %v234_v55 = vrot.slane %v233_v54, 4  ;;  %v228_v56 = vpop.permute.xlu0 %227 }
 0x3f3   :  { %v231_v57 = vmul.f32 %v277_v53, %v228_v56 }
 0x3f4   :  { %v235_v58 = vadd.f32 %v234_v55, %v233_v54 }
 0x3f5   :  { %v240_v59 = vsel %vm232_vm4, %v231_v57, 0.0 }
 0x3f6   :  { %v236_v60 = vrot.slane %v235_v58, 2  ;;  %v241_v61 = vrot.slane %v240_v59, 4 }
 0x3f8   :  { %v237_v62 = vadd.f32 %v236_v60, %v235_v58  ;;  %v242_v63 = vadd.f32 %v241_v61, %v240_v59 }
 0x3fa   :  { %v243_v0 = vrot.slane %v242_v63, 2  ;;  %v238_v1 = vrot.slane %v237_v62, 1 }
 0x3fc   :  { %v244_v2 = vadd.f32 %v243_v0, %v242_v63  ;;  %v239_v4 = vadd.f32 %v238_v1, %v237_v62 }
 0x3fe   :  { %v245_v3 = vrot.slane %v244_v2, 1 }
 0x400   :  { %v246_v5 = vadd.f32 %v245_v3, %v244_v2 }
 0x402   :  { %v249_v6 = vsel %vm157_vm2, %v246_v5, %v239_v4 }
 0x403   :  { %252 = vst.msk [vmem:[#allocation8] sm:$0x3] %vm251_vm5, %v249_v6 }
 0x404   :  { %386 = shalt.err (!%p383_p0)
}
 0x405   :  { %s387_s30 = scalar_lea.hbm %s513_s4, 32 }
 0x406   :  { %p388_p1 = scmp.ne.s32.totalorder %s513_s4, %s387_s30  ;;  %p391_p2 = scmp.lt.u32.totalorder %s387_s30, %s513_s4 }
 0x408   :  { %p393_p3 = pnand %p391_p2, %p388_p1 }
 0x40a   :  { %396 = shalt.err (!%p393_p3)
}
 0x40b   :  { %262 = dma.vmem_to_hbm [thread:$0]  %s260_s3, 32, %s513_s4, [#allocation4]  }
 0x40c   :  { %401 = dma.done.wait [#allocation4], 32  }
 0x40d   :  { %402 = vsyncadd [#allocation4], 4294967264 }
 0x40e   :  { %266 = vsyncpa [#allocation3], 1 }
 0x40f   :  { %267 = vsyncpa [#allocation6], 1 }
 0x410   :  { %268 = vsyncpa [#allocation4], 1 }

</bundles_post_ra>
